<compile_context>
chip_gen: v7x
topology: tpu7x:2x2x1
jax: 0.10.0
libtpu: 0.0.40
codegen_flags: <defaults>
</compile_context>

<pallas_src>
import jax
import jax.numpy as jnp
from jax import lax
from jax.experimental import pallas as pl
from jax.experimental.pallas import tpu as pltpu


def _ddpm_gather_kernel(t_ref, alpha_ref, beta_out_ref, alpha_out_ref):
    # t_ref:         (B,)  int32   in SMEM
    # alpha_ref:     (N,)  float32 in SMEM   (cumprod table)
    # beta_out_ref:  (B,)  float32 in SMEM
    # alpha_out_ref: (B,)  float32 in SMEM
    b = t_ref.shape[0]
    n = alpha_ref.shape[0]

    # Trace-time constants, hoisted out of the loop body.
    n_minus_1 = n - 1
    beta_start = jnp.float32(1e-4)
    beta_step = jnp.float32((2e-2 - 1e-4) / (n - 1)) if n > 1 else jnp.float32(0.0)

    def body(i, carry):
        idx = t_ref[i]
        # PyTorch-style negative-index wrap (applied once: t in [-N, 0)).
        idx = jnp.where(idx < 0, idx + n, idx)
        # Flag out-of-range indices when debug checks are enabled; otherwise
        # clamp instead of silently reading garbage.
        pl.debug_check(jnp.logical_and(idx >= 0, idx <= n_minus_1),
                       "DDPM_Scheduler: timestep index out of range")
        idx = jnp.clip(idx, 0, n_minus_1)
        # beta is exactly linear -> compute analytically (matches the
        # jnp.linspace table to within 1 ulp); saves a table DMA + SMEM load.
        beta_out_ref[i] = beta_start + idx.astype(jnp.float32) * beta_step
        alpha_out_ref[i] = alpha_ref[idx]
        return carry

    # Full unroll for small batches (straight-line scalar code for the LLO
    # scheduler); partial unroll for large batches to bound code size while
    # keeping both scalar-ALU slots fed.
    lax.fori_loop(0, b, body, 0, unroll=True if b <= 64 else 8)


@jax.jit
def _ddpm_forward(t_flat, alpha_table):
    b = t_flat.shape[0]
    smem = pltpu.MemorySpace.SMEM
    return pl.pallas_call(
        _ddpm_gather_kernel,
        out_shape=[
            jax.ShapeDtypeStruct((b,), jnp.float32),
            jax.ShapeDtypeStruct((b,), jnp.float32),
        ],
        in_specs=[
            pl.BlockSpec(memory_space=smem),   # t            (1-D int32)
            pl.BlockSpec(memory_space=smem),   # alpha table  (1-D float32)
        ],
        out_specs=[
            pl.BlockSpec(memory_space=smem),
            pl.BlockSpec(memory_space=smem),
        ],
    )(t_flat, alpha_table)


class DDPMSchedulerPallas:
    """JAX/Pallas equivalent of the PyTorch DDPM_Scheduler module."""

    def __init__(self, num_time_steps: int = 1000):
        self.num_time_steps = int(num_time_steps)
        # Deterministic "parameter" construction, matching torch.linspace /
        # torch.cumprod semantics (float32).
        self.beta = jnp.linspace(0.0001, 0.02, self.num_time_steps, dtype=jnp.float32)
        self.alpha = jnp.cumprod(1.0 - self.beta, axis=0).astype(jnp.float32)

    def __call__(self, t):
        t = jnp.asarray(t, dtype=jnp.int32)
        orig_shape = t.shape
        t_flat = t.reshape(-1)
        beta_t, alpha_t = _ddpm_forward(t_flat, self.alpha)
        return beta_t.reshape(orig_shape), alpha_t.reshape(orig_shape)


if __name__ == "__main__":
    num_time_steps = 1000
    sched = DDPMSchedulerPallas(num_time_steps=num_time_steps)

    # Small deterministic batch of timestep indices.
    key = jax.random.PRNGKey(0)
    t = jax.random.randint(key, (8,), minval=0, maxval=num_time_steps, dtype=jnp.int32)

    beta_t, alpha_t = sched(t)
    beta_t = jax.block_until_ready(beta_t)
    alpha_t = jax.block_until_ready(alpha_t)

    # Reference check against plain JAX gather.
    beta_ref = sched.beta[t]
    alpha_ref = sched.alpha[t]
    assert beta_t.shape == t.shape and alpha_t.shape == t.shape
    assert jnp.allclose(beta_t, beta_ref, atol=1e-7)
    assert jnp.allclose(alpha_t, alpha_ref, atol=1e-7)
    assert beta_t.dtype == jnp.float32 and alpha_t.dtype == jnp.float32

    # Second call exercises the jit cache (no retrace / re-dispatch overhead).
    beta_t2, alpha_t2 = sched(t)
    jax.block_until_ready(beta_t2)
    assert jnp.allclose(beta_t2, beta_ref, atol=1e-7)
    assert jnp.allclose(alpha_t2, alpha_ref, atol=1e-7)

    print("KERNEL_OK")
</pallas_src>

<mosaic_0001>
module attributes {stable_mosaic.version = 11 : i64} {
  func.func @_ddpm_gather_kernel(%arg0: memref<8xi32, #tpu.memory_space<smem>>, %arg1: memref<1000xf32, #tpu.memory_space<smem>>, %arg2: memref<8xf32, #tpu.memory_space<smem>>, %arg3: memref<8xf32, #tpu.memory_space<smem>>) attributes {dimension_semantics = [], scalar_prefetch = 0 : i64, scratch_operands = 0 : i64, tpu.core_type = #tpu.core_type<tc>} {
    %cst = arith.constant 1.99199203E-5 : f32
    %cst_0 = arith.constant 9.99999974E-5 : f32
    %c0_i32 = arith.constant 0 : i32
    %0 = arith.index_cast %c0_i32 : i32 to index
    %1 = memref.load %arg0[%0] : memref<8xi32, #tpu.memory_space<smem>>
    %c0_i32_1 = arith.constant 0 : i32
    %2 = arith.cmpi slt, %1, %c0_i32_1 : i32
    %c1000_i32 = arith.constant 1000 : i32
    %3 = arith.addi %1, %c1000_i32 : i32
    %4 = arith.select %2, %3, %1 : i32
    %c0_i32_2 = arith.constant 0 : i32
    %5 = arith.cmpi sge, %4, %c0_i32_2 : i32
    %c999_i32 = arith.constant 999 : i32
    %6 = arith.cmpi sle, %4, %c999_i32 : i32
    %7 = arith.andi %5, %6 : i1
    %true = arith.constant true
    %8 = arith.xori %7, %true : i1
    %false = arith.constant false
    %9 = arith.ori %false, %8 : i1
    %false_3 = arith.constant false
    %c1_i32 = arith.constant 1 : i32
    %c-1_i32 = arith.constant -1 : i32
    %10 = arith.select %false_3, %c-1_i32, %c1_i32 : i32
    %c0_i32_4 = arith.constant 0 : i32
    %c999_i32_5 = arith.constant 999 : i32
    %11 = arith.maxsi %c0_i32_4, %4 : i32
    %12 = arith.minsi %c999_i32_5, %11 : i32
    %13 = arith.sitofp %12 : i32 to f32
    %14 = arith.mulf %13, %cst : f32
    %15 = arith.addf %cst_0, %14 : f32
    %16 = arith.index_cast %c0_i32 : i32 to index
    %17 = memref.load %arg2[%16] : memref<8xf32, #tpu.memory_space<smem>>
    memref.store %15, %arg2[%16] : memref<8xf32, #tpu.memory_space<smem>>
    %18 = arith.index_cast %12 : i32 to index
    %19 = memref.load %arg1[%18] : memref<1000xf32, #tpu.memory_space<smem>>
    %20 = arith.index_cast %c0_i32 : i32 to index
    %21 = memref.load %arg3[%20] : memref<8xf32, #tpu.memory_space<smem>>
    memref.store %19, %arg3[%20] : memref<8xf32, #tpu.memory_space<smem>>
    %c1_i32_6 = arith.constant 1 : i32
    %22 = arith.index_cast %c1_i32_6 : i32 to index
    %23 = memref.load %arg0[%22] : memref<8xi32, #tpu.memory_space<smem>>
    %c0_i32_7 = arith.constant 0 : i32
    %24 = arith.cmpi slt, %23, %c0_i32_7 : i32
    %c1000_i32_8 = arith.constant 1000 : i32
    %25 = arith.addi %23, %c1000_i32_8 : i32
    %26 = arith.select %24, %25, %23 : i32
    %c0_i32_9 = arith.constant 0 : i32
    %27 = arith.cmpi sge, %26, %c0_i32_9 : i32
    %c999_i32_10 = arith.constant 999 : i32
    %28 = arith.cmpi sle, %26, %c999_i32_10 : i32
    %29 = arith.andi %27, %28 : i1
    %true_11 = arith.constant true
    %30 = arith.xori %29, %true_11 : i1
    %false_12 = arith.constant false
    %31 = arith.ori %false_12, %30 : i1
    %false_13 = arith.constant false
    %c1_i32_14 = arith.constant 1 : i32
    %c-1_i32_15 = arith.constant -1 : i32
    %32 = arith.select %false_13, %c-1_i32_15, %c1_i32_14 : i32
    %c0_i32_16 = arith.constant 0 : i32
    %c999_i32_17 = arith.constant 999 : i32
    %33 = arith.maxsi %c0_i32_16, %26 : i32
    %34 = arith.minsi %c999_i32_17, %33 : i32
    %35 = arith.sitofp %34 : i32 to f32
    %36 = arith.mulf %35, %cst : f32
    %37 = arith.addf %cst_0, %36 : f32
    %38 = arith.index_cast %c1_i32_6 : i32 to index
    %39 = memref.load %arg2[%38] : memref<8xf32, #tpu.memory_space<smem>>
    memref.store %37, %arg2[%38] : memref<8xf32, #tpu.memory_space<smem>>
    %40 = arith.index_cast %34 : i32 to index
    %41 = memref.load %arg1[%40] : memref<1000xf32, #tpu.memory_space<smem>>
    %42 = arith.index_cast %c1_i32_6 : i32 to index
    %43 = memref.load %arg3[%42] : memref<8xf32, #tpu.memory_space<smem>>
    memref.store %41, %arg3[%42] : memref<8xf32, #tpu.memory_space<smem>>
    %c2_i32 = arith.constant 2 : i32
    %44 = arith.index_cast %c2_i32 : i32 to index
    %45 = memref.load %arg0[%44] : memref<8xi32, #tpu.memory_space<smem>>
    %c0_i32_18 = arith.constant 0 : i32
    %46 = arith.cmpi slt, %45, %c0_i32_18 : i32
    %c1000_i32_19 = arith.constant 1000 : i32
    %47 = arith.addi %45, %c1000_i32_19 : i32
    %48 = arith.select %46, %47, %45 : i32
    %c0_i32_20 = arith.constant 0 : i32
    %49 = arith.cmpi sge, %48, %c0_i32_20 : i32
    %c999_i32_21 = arith.constant 999 : i32
    %50 = arith.cmpi sle, %48, %c999_i32_21 : i32
    %51 = arith.andi %49, %50 : i1
    %true_22 = arith.constant true
    %52 = arith.xori %51, %true_22 : i1
    %false_23 = arith.constant false
    %53 = arith.ori %false_23, %52 : i1
    %false_24 = arith.constant false
    %c1_i32_25 = arith.constant 1 : i32
    %c-1_i32_26 = arith.constant -1 : i32
    %54 = arith.select %false_24, %c-1_i32_26, %c1_i32_25 : i32
    %c0_i32_27 = arith.constant 0 : i32
    %c999_i32_28 = arith.constant 999 : i32
    %55 = arith.maxsi %c0_i32_27, %48 : i32
    %56 = arith.minsi %c999_i32_28, %55 : i32
    %57 = arith.sitofp %56 : i32 to f32
    %58 = arith.mulf %57, %cst : f32
    %59 = arith.addf %cst_0, %58 : f32
    %60 = arith.index_cast %c2_i32 : i32 to index
    %61 = memref.load %arg2[%60] : memref<8xf32, #tpu.memory_space<smem>>
    memref.store %59, %arg2[%60] : memref<8xf32, #tpu.memory_space<smem>>
    %62 = arith.index_cast %56 : i32 to index
    %63 = memref.load %arg1[%62] : memref<1000xf32, #tpu.memory_space<smem>>
    %64 = arith.index_cast %c2_i32 : i32 to index
    %65 = memref.load %arg3[%64] : memref<8xf32, #tpu.memory_space<smem>>
    memref.store %63, %arg3[%64] : memref<8xf32, #tpu.memory_space<smem>>
    %c3_i32 = arith.constant 3 : i32
    %66 = arith.index_cast %c3_i32 : i32 to index
    %67 = memref.load %arg0[%66] : memref<8xi32, #tpu.memory_space<smem>>
    %c0_i32_29 = arith.constant 0 : i32
    %68 = arith.cmpi slt, %67, %c0_i32_29 : i32
    %c1000_i32_30 = arith.constant 1000 : i32
    %69 = arith.addi %67, %c1000_i32_30 : i32
    %70 = arith.select %68, %69, %67 : i32
    %c0_i32_31 = arith.constant 0 : i32
    %71 = arith.cmpi sge, %70, %c0_i32_31 : i32
    %c999_i32_32 = arith.constant 999 : i32
    %72 = arith.cmpi sle, %70, %c999_i32_32 : i32
    %73 = arith.andi %71, %72 : i1
    %true_33 = arith.constant true
    %74 = arith.xori %73, %true_33 : i1
    %false_34 = arith.constant false
    %75 = arith.ori %false_34, %74 : i1
    %false_35 = arith.constant false
    %c1_i32_36 = arith.constant 1 : i32
    %c-1_i32_37 = arith.constant -1 : i32
    %76 = arith.select %false_35, %c-1_i32_37, %c1_i32_36 : i32
    %c0_i32_38 = arith.constant 0 : i32
    %c999_i32_39 = arith.constant 999 : i32
    %77 = arith.maxsi %c0_i32_38, %70 : i32
    %78 = arith.minsi %c999_i32_39, %77 : i32
    %79 = arith.sitofp %78 : i32 to f32
    %80 = arith.mulf %79, %cst : f32
    %81 = arith.addf %cst_0, %80 : f32
    %82 = arith.index_cast %c3_i32 : i32 to index
    %83 = memref.load %arg2[%82] : memref<8xf32, #tpu.memory_space<smem>>
    memref.store %81, %arg2[%82] : memref<8xf32, #tpu.memory_space<smem>>
    %84 = arith.index_cast %78 : i32 to index
    %85 = memref.load %arg1[%84] : memref<1000xf32, #tpu.memory_space<smem>>
    %86 = arith.index_cast %c3_i32 : i32 to index
    %87 = memref.load %arg3[%86] : memref<8xf32, #tpu.memory_space<smem>>
    memref.store %85, %arg3[%86] : memref<8xf32, #tpu.memory_space<smem>>
    %c4_i32 = arith.constant 4 : i32
    %88 = arith.index_cast %c4_i32 : i32 to index
    %89 = memref.load %arg0[%88] : memref<8xi32, #tpu.memory_space<smem>>
    %c0_i32_40 = arith.constant 0 : i32
    %90 = arith.cmpi slt, %89, %c0_i32_40 : i32
    %c1000_i32_41 = arith.constant 1000 : i32
    %91 = arith.addi %89, %c1000_i32_41 : i32
    %92 = arith.select %90, %91, %89 : i32
    %c0_i32_42 = arith.constant 0 : i32
    %93 = arith.cmpi sge, %92, %c0_i32_42 : i32
    %c999_i32_43 = arith.constant 999 : i32
    %94 = arith.cmpi sle, %92, %c999_i32_43 : i32
    %95 = arith.andi %93, %94 : i1
    %true_44 = arith.constant true
    %96 = arith.xori %95, %true_44 : i1
    %false_45 = arith.constant false
    %97 = arith.ori %false_45, %96 : i1
    %false_46 = arith.constant false
    %c1_i32_47 = arith.constant 1 : i32
    %c-1_i32_48 = arith.constant -1 : i32
    %98 = arith.select %false_46, %c-1_i32_48, %c1_i32_47 : i32
    %c0_i32_49 = arith.constant 0 : i32
    %c999_i32_50 = arith.constant 999 : i32
    %99 = arith.maxsi %c0_i32_49, %92 : i32
    %100 = arith.minsi %c999_i32_50, %99 : i32
    %101 = arith.sitofp %100 : i32 to f32
    %102 = arith.mulf %101, %cst : f32
    %103 = arith.addf %cst_0, %102 : f32
    %104 = arith.index_cast %c4_i32 : i32 to index
    %105 = memref.load %arg2[%104] : memref<8xf32, #tpu.memory_space<smem>>
    memref.store %103, %arg2[%104] : memref<8xf32, #tpu.memory_space<smem>>
    %106 = arith.index_cast %100 : i32 to index
    %107 = memref.load %arg1[%106] : memref<1000xf32, #tpu.memory_space<smem>>
    %108 = arith.index_cast %c4_i32 : i32 to index
    %109 = memref.load %arg3[%108] : memref<8xf32, #tpu.memory_space<smem>>
    memref.store %107, %arg3[%108] : memref<8xf32, #tpu.memory_space<smem>>
    %c5_i32 = arith.constant 5 : i32
    %110 = arith.index_cast %c5_i32 : i32 to index
    %111 = memref.load %arg0[%110] : memref<8xi32, #tpu.memory_space<smem>>
    %c0_i32_51 = arith.constant 0 : i32
    %112 = arith.cmpi slt, %111, %c0_i32_51 : i32
    %c1000_i32_52 = arith.constant 1000 : i32
    %113 = arith.addi %111, %c1000_i32_52 : i32
    %114 = arith.select %112, %113, %111 : i32
    %c0_i32_53 = arith.constant 0 : i32
    %115 = arith.cmpi sge, %114, %c0_i32_53 : i32
    %c999_i32_54 = arith.constant 999 : i32
    %116 = arith.cmpi sle, %114, %c999_i32_54 : i32
    %117 = arith.andi %115, %116 : i1
    %true_55 = arith.constant true
    %118 = arith.xori %117, %true_55 : i1
    %false_56 = arith.constant false
    %119 = arith.ori %false_56, %118 : i1
    %false_57 = arith.constant false
    %c1_i32_58 = arith.constant 1 : i32
    %c-1_i32_59 = arith.constant -1 : i32
    %120 = arith.select %false_57, %c-1_i32_59, %c1_i32_58 : i32
    %c0_i32_60 = arith.constant 0 : i32
    %c999_i32_61 = arith.constant 999 : i32
    %121 = arith.maxsi %c0_i32_60, %114 : i32
    %122 = arith.minsi %c999_i32_61, %121 : i32
    %123 = arith.sitofp %122 : i32 to f32
    %124 = arith.mulf %123, %cst : f32
    %125 = arith.addf %cst_0, %124 : f32
    %126 = arith.index_cast %c5_i32 : i32 to index
    %127 = memref.load %arg2[%126] : memref<8xf32, #tpu.memory_space<smem>>
    memref.store %125, %arg2[%126] : memref<8xf32, #tpu.memory_space<smem>>
    %128 = arith.index_cast %122 : i32 to index
    %129 = memref.load %arg1[%128] : memref<1000xf32, #tpu.memory_space<smem>>
    %130 = arith.index_cast %c5_i32 : i32 to index
    %131 = memref.load %arg3[%130] : memref<8xf32, #tpu.memory_space<smem>>
    memref.store %129, %arg3[%130] : memref<8xf32, #tpu.memory_space<smem>>
    %c6_i32 = arith.constant 6 : i32
    %132 = arith.index_cast %c6_i32 : i32 to index
    %133 = memref.load %arg0[%132] : memref<8xi32, #tpu.memory_space<smem>>
    %c0_i32_62 = arith.constant 0 : i32
    %134 = arith.cmpi slt, %133, %c0_i32_62 : i32
    %c1000_i32_63 = arith.constant 1000 : i32
    %135 = arith.addi %133, %c1000_i32_63 : i32
    %136 = arith.select %134, %135, %133 : i32
    %c0_i32_64 = arith.constant 0 : i32
    %137 = arith.cmpi sge, %136, %c0_i32_64 : i32
    %c999_i32_65 = arith.constant 999 : i32
    %138 = arith.cmpi sle, %136, %c999_i32_65 : i32
    %139 = arith.andi %137, %138 : i1
    %true_66 = arith.constant true
    %140 = arith.xori %139, %true_66 : i1
    %false_67 = arith.constant false
    %141 = arith.ori %false_67, %140 : i1
    %false_68 = arith.constant false
    %c1_i32_69 = arith.constant 1 : i32
    %c-1_i32_70 = arith.constant -1 : i32
    %142 = arith.select %false_68, %c-1_i32_70, %c1_i32_69 : i32
    %c0_i32_71 = arith.constant 0 : i32
    %c999_i32_72 = arith.constant 999 : i32
    %143 = arith.maxsi %c0_i32_71, %136 : i32
    %144 = arith.minsi %c999_i32_72, %143 : i32
    %145 = arith.sitofp %144 : i32 to f32
    %146 = arith.mulf %145, %cst : f32
    %147 = arith.addf %cst_0, %146 : f32
    %148 = arith.index_cast %c6_i32 : i32 to index
    %149 = memref.load %arg2[%148] : memref<8xf32, #tpu.memory_space<smem>>
    memref.store %147, %arg2[%148] : memref<8xf32, #tpu.memory_space<smem>>
    %150 = arith.index_cast %144 : i32 to index
    %151 = memref.load %arg1[%150] : memref<1000xf32, #tpu.memory_space<smem>>
    %152 = arith.index_cast %c6_i32 : i32 to index
    %153 = memref.load %arg3[%152] : memref<8xf32, #tpu.memory_space<smem>>
    memref.store %151, %arg3[%152] : memref<8xf32, #tpu.memory_space<smem>>
    %c7_i32 = arith.constant 7 : i32
    %154 = arith.index_cast %c7_i32 : i32 to index
    %155 = memref.load %arg0[%154] : memref<8xi32, #tpu.memory_space<smem>>
    %c0_i32_73 = arith.constant 0 : i32
    %156 = arith.cmpi slt, %155, %c0_i32_73 : i32
    %c1000_i32_74 = arith.constant 1000 : i32
    %157 = arith.addi %155, %c1000_i32_74 : i32
    %158 = arith.select %156, %157, %155 : i32
    %c0_i32_75 = arith.constant 0 : i32
    %159 = arith.cmpi sge, %158, %c0_i32_75 : i32
    %c999_i32_76 = arith.constant 999 : i32
    %160 = arith.cmpi sle, %158, %c999_i32_76 : i32
    %161 = arith.andi %159, %160 : i1
    %true_77 = arith.constant true
    %162 = arith.xori %161, %true_77 : i1
    %false_78 = arith.constant false
    %163 = arith.ori %false_78, %162 : i1
    %false_79 = arith.constant false
    %c1_i32_80 = arith.constant 1 : i32
    %c-1_i32_81 = arith.constant -1 : i32
    %164 = arith.select %false_79, %c-1_i32_81, %c1_i32_80 : i32
    %c0_i32_82 = arith.constant 0 : i32
    %c999_i32_83 = arith.constant 999 : i32
    %165 = arith.maxsi %c0_i32_82, %158 : i32
    %166 = arith.minsi %c999_i32_83, %165 : i32
    %167 = arith.sitofp %166 : i32 to f32
    %168 = arith.mulf %167, %cst : f32
    %169 = arith.addf %cst_0, %168 : f32
    %170 = arith.index_cast %c7_i32 : i32 to index
    %171 = memref.load %arg2[%170] : memref<8xf32, #tpu.memory_space<smem>>
    memref.store %169, %arg2[%170] : memref<8xf32, #tpu.memory_space<smem>>
    %172 = arith.index_cast %166 : i32 to index
    %173 = memref.load %arg1[%172] : memref<1000xf32, #tpu.memory_space<smem>>
    %174 = arith.index_cast %c7_i32 : i32 to index
    %175 = memref.load %arg3[%174] : memref<8xf32, #tpu.memory_space<smem>>
    memref.store %173, %arg3[%174] : memref<8xf32, #tpu.memory_space<smem>>
    %c8_i32 = arith.constant 8 : i32
    return
  }
}

</mosaic_0001>

<bundles_post_ra>
// kernel: _ddpm_forward.1
= control target key start
LH: loop header
LB: loop body
LE: loop exit
PB: predicated region body
PF: predicated region fallthrough
CT: control target
= control target key end

     0   :  { %9 = vsyncpa [#allocation3], 0  ;;  %s424_s0 = inlined_call_operand.hbm [shape: s32[8], index: 0, kind: input, shape index: {}]   ;;  %s425_s1 = inlined_call_operand.hbm [shape: f32[1000], index: 1, kind: input, shape index: {}]   ;;  %s426_s2 = inlined_call_operand.hbm [shape: f32[8], index: 2, kind: output, shape index: {0}]   ;;  %s427_s3 = inlined_call_operand.hbm [shape: f32[8], index: 3, kind: output, shape index: {1}]  }
   0x1   :  { %10 = vsyncpa [#allocation6], 0 }
   0x2   :  { %11 = vsyncpa [#allocation4], 0 }
   0x3   :  { %12 = vsyncpa [#allocation9], 0  ;;  %s258_s14 = scalar_lea.hbm %s424_s0, 16 }
   0x4   :  { %p259_p0 = scmp.ne.s32.totalorder %s424_s0, %s258_s14  ;;  %p262_p1 = scmp.lt.u32.totalorder %s258_s14, %s424_s0 }
   0x6   :  { %p264_p2 = pnand %p262_p1, %p259_p0 }
   0x8   :  { %267 = shalt.err (!%p264_p2)
}
   0x9   :  { %s306_s19 = smov [#allocation2]   ;;  %s268_s24 = scalar_lea.hbm %s425_s1, 128 }
   0xa   :  { %20 = dma.hbm_to_smem %s424_s0, 16, %s306_s19, [#allocation3]  }
   0xb   :  { %p269_p3 = scmp.ne.s32.totalorder %s425_s1, %s268_s24  ;;  %p272_p4 = scmp.lt.u32.totalorder %s268_s24, %s425_s1 }
   0xd   :  { %p274_p5 = pnand %p272_p4, %p269_p3 }
   0xf   :  { %277 = shalt.err (!%p274_p5)
}
  0x10   :  { %s307_s29 = smov [#allocation5]  }
  0x11   :  { %28 = dma.hbm_to_smem %s425_s1, 128, %s307_s29, [#allocation6]  }
  0x12   :  { %298 = dma.done.wait [#allocation3], 16  }
  0x13   :  { %299 = vsyncadd [#allocation3], 4294967280 }
  0x14   :  { %300 = dma.done.wait [#allocation6], 128  }
  0x15   :  { %301 = vsyncadd [#allocation6], 4294967168 }
  0x16   :  { %35 = sfence }
  0x17   :  { %s36_s0 = sld [smem:[#allocation2]]  ;;  %s196_s5 = sld [smem:[#allocation2 + $0x1]] }
  0x18   :  { %s354_s6 = sld [smem:[#allocation2 + $0x2]]  ;;  %s356_s7 = sld [smem:[#allocation2 + $0x3]] }
  0x19   :  { %s358_s8 = sld [smem:[#allocation2 + $0x4]]  ;;  %s360_s9 = sld [smem:[#allocation2 + $0x5]] }
  0x1a   :  { %s367_s12 = sld [smem:[#allocation2 + $0x6]]  ;;  %s370_s14 = sld [smem:[#allocation2 + $0x7]] }
  0x1d   :  { %p37_p6 = scmp.lt.s32.totalorder %s36_s0, 0  ;;  %s38_s10 = sadd.s32 1000, %s36_s0 }
  0x1e   :  { %p53_p7 = scmp.lt.s32.totalorder %s196_s5, 0  ;;  %s54_s11 = sadd.s32 1000, %s196_s5 }
  0x1f   :  { %s429_s10 = smov (!%p37_p6, %s38_s10), %s36_s0  ;;  %p69_p12 = scmp.lt.s32.totalorder %s354_s6, 0 }
  0x20   :  { %s431_s11 = smov (!%p53_p7, %s54_s11), %s196_s5  ;;  %p40_p8 = scmp.gt.s32.totalorder %s429_s10, 0 }
  0x21   :  { %p191_p9 = scmp.lt.s32.totalorder %s429_s10, 999  ;;  %p56_p10 = scmp.gt.s32.totalorder %s431_s11, 0 }
  0x22   :  { %p197_p11 = scmp.lt.s32.totalorder %s431_s11, 999  ;;  %s433_s10 = smov (!%p40_p8, %s429_s10), 0 }
  0x23   :  { %s435_s11 = smov (!%p56_p10, %s431_s11), 0  ;;  %s437_s10 = smov (!%p191_p9, %s433_s10), 999 }
  0x24   :  { %s439_s11 = smov (!%p197_p11, %s435_s11), 999  ;;  %s44_s1 = scvt.s32.f32 %s437_s10 }
  0x25   :  { %s60_s13 = scvt.s32.f32 %s439_s11  ;;  %s70_s17 = sadd.s32 1000, %s354_s6 }
  0x26   :  { %s45_s15 = smul.f32 1.991992e-05, %s44_s1  ;;  %p85_p13 = scmp.lt.s32.totalorder %s356_s7, 0 }
  0x27   :  { %s61_s16 = smul.f32 1.991992e-05, %s60_s13  ;;  %s86_s20 = sadd.s32 1000, %s356_s7 }
  0x28   :  { %s46_s18 = sadd.f32 0.0001, %s45_s15  ;;  %p101_p0 = scmp.lt.s32.totalorder %s358_s8, 0 }
  0x29   :  { %s62_s19 = sadd.f32 0.0001, %s61_s16  ;;  %s102_s21 = sadd.s32 1000, %s358_s8 }
  0x2a   :  { %48 = sst [smem:[#allocation7]] %s46_s18  ;;  %s441_s17 = smov (!%p69_p12, %s70_s17), %s354_s6 }
  0x2b   :  { %64 = sst [smem:[#allocation7 + $0x1]] %s62_s19  ;;  %s443_s20 = smov (!%p85_p13, %s86_s20), %s356_s7 }
  0x2c   :  { %p72_p1 = scmp.gt.s32.totalorder %s441_s17, 0  ;;  %p203_p2 = scmp.lt.s32.totalorder %s441_s17, 999 }
  0x2d   :  { %p88_p3 = scmp.gt.s32.totalorder %s443_s20, 0  ;;  %p209_p4 = scmp.lt.s32.totalorder %s443_s20, 999 }
  0x2e   :  { %s445_s17 = smov (!%p72_p1, %s441_s17), 0  ;;  %p117_p5 = scmp.lt.s32.totalorder %s360_s9, 0 }
  0x2f   :  { %s447_s20 = smov (!%p88_p3, %s443_s20), 0  ;;  %s449_s17 = smov (!%p203_p2, %s445_s17), 999 }
  0x30   :  { %s451_s20 = smov (!%p209_p4, %s447_s20), 999  ;;  %s76_s22 = scvt.s32.f32 %s449_s17 }
  0x31   :  { %s92_s23 = scvt.s32.f32 %s451_s20  ;;  %s118_s24 = sadd.s32 1000, %s360_s9 }
  0x32   :  { %s77_s25 = smul.f32 1.991992e-05, %s76_s22  ;;  %p133_p6 = scmp.lt.s32.totalorder %s367_s12, 0 }
  0x33   :  { %s93_s26 = smul.f32 1.991992e-05, %s92_s23  ;;  %s134_s27 = sadd.s32 1000, %s367_s12 }
  0x34   :  { %s78_s28 = sadd.f32 0.0001, %s77_s25  ;;  %s49_s29 = sld [smem:[#allocation5 + %s437_s10]] }
  0x35   :  { %s94_s30 = sadd.f32 0.0001, %s93_s26  ;;  %s65_s4 = sld [smem:[#allocation5 + %s439_s11]] }
  0x36   :  { %80 = sst [smem:[#allocation7 + $0x2]] %s78_s28  ;;  %s453_s21 = smov (!%p101_p0, %s102_s21), %s358_s8 }
  0x37   :  { %s81_s0 = sld [smem:[#allocation5 + %s449_s17]]  ;;  %s455_s24 = smov (!%p117_p5, %s118_s24), %s360_s9 }
  0x38   :  { %96 = sst [smem:[#allocation7 + $0x3]] %s94_s30  ;;  %p104_p7 = scmp.gt.s32.totalorder %s453_s21, 0 }
  0x39   :  { %s97_s5 = sld [smem:[#allocation5 + %s451_s20]]  ;;  %p215_p8 = scmp.lt.s32.totalorder %s453_s21, 999 }
  0x3a   :  { %p120_p9 = scmp.gt.s32.totalorder %s455_s24, 0  ;;  %p221_p10 = scmp.lt.s32.totalorder %s455_s24, 999 }
  0x3b   :  { %s457_s21 = smov (!%p104_p7, %s453_s21), 0  ;;  %51 = sst [smem:[#allocation8]] %s49_s29 }
  0x3c   :  { %s459_s24 = smov (!%p120_p9, %s455_s24), 0  ;;  %s461_s21 = smov (!%p215_p8, %s457_s21), 999 }
  0x3d   :  { %s463_s24 = smov (!%p221_p10, %s459_s24), 999  ;;  %s108_s6 = scvt.s32.f32 %s461_s21 }
  0x3e   :  { %s124_s7 = scvt.s32.f32 %s463_s24  ;;  %67 = sst [smem:[#allocation8 + $0x1]] %s65_s4 }
  0x3f   :  { %s109_s8 = smul.f32 1.991992e-05, %s108_s6  ;;  %83 = sst [smem:[#allocation8 + $0x2]] %s81_s0 }
  0x40   :  { %s125_s9 = smul.f32 1.991992e-05, %s124_s7  ;;  %99 = sst [smem:[#allocation8 + $0x3]] %s97_s5 }
  0x41   :  { %s110_s10 = sadd.f32 0.0001, %s109_s8  ;;  %p149_p11 = scmp.lt.s32.totalorder %s370_s14, 0 }
  0x42   :  { %s126_s11 = sadd.f32 0.0001, %s125_s9  ;;  %s150_s1 = sadd.s32 1000, %s370_s14 }
  0x43   :  { %112 = sst [smem:[#allocation7 + $0x4]] %s110_s10  ;;  %s465_s27 = smov (!%p133_p6, %s134_s27), %s367_s12 }
  0x44   :  { %s113_s13 = sld [smem:[#allocation5 + %s461_s21]]  ;;  %s467_s1 = smov (!%p149_p11, %s150_s1), %s370_s14 }
  0x45   :  { %128 = sst [smem:[#allocation7 + $0x5]] %s126_s11  ;;  %p136_p12 = scmp.gt.s32.totalorder %s465_s27, 0 }
  0x46   :  { %s129_s15 = sld [smem:[#allocation5 + %s463_s24]]  ;;  %p227_p13 = scmp.lt.s32.totalorder %s465_s27, 999 }
  0x47   :  { %p152_p0 = scmp.gt.s32.totalorder %s467_s1, 0  ;;  %p233_p1 = scmp.lt.s32.totalorder %s467_s1, 999 }
  0x48   :  { %s469_s27 = smov (!%p136_p12, %s465_s27), 0  ;;  %s278_s24 = scalar_lea.hbm %s426_s2, 16 }
  0x49   :  { %s471_s1 = smov (!%p152_p0, %s467_s1), 0  ;;  %s473_s27 = smov (!%p227_p13, %s469_s27), 999 }
  0x4a   :  { %s475_s1 = smov (!%p233_p1, %s471_s1), 999  ;;  %s140_s16 = scvt.s32.f32 %s473_s27 }
  0x4b   :  { %115 = sst [smem:[#allocation8 + $0x4]] %s113_s13  ;;  %s156_s17 = scvt.s32.f32 %s475_s1 }
  0x4c   :  { %131 = sst [smem:[#allocation8 + $0x5]] %s129_s15  ;;  %s141_s18 = smul.f32 1.991992e-05, %s140_s16 }
  0x4d   :  { %s145_s19 = sld [smem:[#allocation5 + %s473_s27]]  ;;  %s157_s20 = smul.f32 1.991992e-05, %s156_s17 }
  0x4e   :  { %s161_s21 = sld [smem:[#allocation5 + %s475_s1]]  ;;  %s142_s22 = sadd.f32 0.0001, %s141_s18 }
  0x4f   :  { %s158_s23 = sadd.f32 0.0001, %s157_s20  ;;  %p279_p2 = scmp.ne.s32.totalorder %s426_s2, %s278_s24 }
  0x50   :  { %144 = sst [smem:[#allocation7 + $0x6]] %s142_s22  ;;  %p282_p3 = scmp.lt.u32.totalorder %s278_s24, %s426_s2 }
  0x51   :  { %160 = sst [smem:[#allocation7 + $0x7]] %s158_s23 }
  0x52   :  { %p284_p4 = pnand %p282_p3, %p279_p2 }
  0x54   :  { %287 = shalt.err (!%p284_p4)
}
  0x55   :  { %s308_s27 = smov [#allocation7]   ;;  %147 = sst [smem:[#allocation8 + $0x6]] %s145_s19 }
  0x56   :  { %171 = dma.smem_to_hbm %s308_s27, 16, %s426_s2, [#allocation4]  }
  0x57   :  { %163 = sst [smem:[#allocation8 + $0x7]] %s161_s21  ;;  %s288_s6 = scalar_lea.hbm %s427_s3, 16 }
  0x58   :  { %p289_p5 = scmp.ne.s32.totalorder %s427_s3, %s288_s6  ;;  %p292_p6 = scmp.lt.u32.totalorder %s288_s6, %s427_s3 }
  0x5a   :  { %p294_p7 = pnand %p292_p6, %p289_p5 }
  0x5c   :  { %297 = shalt.err (!%p294_p7)
}
  0x5d   :  { %s309_s11 = smov [#allocation8]  }
  0x5e   :  { %179 = dma.smem_to_hbm %s309_s11, 16, %s427_s3, [#allocation9]  }
  0x5f   :  { %302 = dma.done.wait [#allocation4], 16  }
  0x60   :  { %303 = vsyncadd [#allocation4], 4294967280 }
  0x61   :  { %304 = dma.done.wait [#allocation9], 16  }
  0x62   :  { %305 = vsyncadd [#allocation9], 4294967280 }
  0x63   :  { %186 = sfence }
  0x64   :  { %187 = vsyncpa [#allocation3], 1 }
  0x65   :  { %188 = vsyncpa [#allocation6], 1 }
  0x66   :  { %189 = vsyncpa [#allocation4], 1 }
  0x67   :  { %190 = vsyncpa [#allocation9], 1 }

</bundles_post_ra>
